<compile_context>
chip_gen: v5e
topology: v5e:2x2
jax: 0.10.0
libtpu: 0.0.40
codegen_flags: <defaults>
</compile_context>

<pallas_src>
import jax
import jax.numpy as jnp
from jax.experimental import pallas as pl
from jax.experimental.pallas import tpu as pltpu


def _gelu_exact(x):
    # PyTorch F.gelu default ("none" approximation): 0.5*x*(1+erf(x/sqrt(2)))
    inv_sqrt2 = jnp.asarray(0.7071067811865476, dtype=x.dtype)
    return 0.5 * x * (1.0 + jax.lax.erf(x * inv_sqrt2))


def ffn_kernel(x_ref, w1a_ref, w1b_ref, b1a_ref, b1b_ref, w2_ref, b2_ref, o_ref):
    # x_ref:   (TM, C)
    # w1a_ref: (C, H)  -> value half of the first Linear
    # w1b_ref: (C, H)  -> gate  half of the first Linear
    # b1a_ref: (1, H) f32, b1b_ref: (1, H) f32
    # w2_ref:  (H, C), b2_ref: (1, C) f32
    x = x_ref[...]  # native dtype straight into the MXU

    # First Linear, split into the two GEGLU halves (no (TM, 2H) intermediate,
    # no lane slicing). f32 accumulation on the MXU.
    a = jnp.dot(x, w1a_ref[...], preferred_element_type=jnp.float32) + b1a_ref[...]
    g = jnp.dot(x, w1b_ref[...], preferred_element_type=jnp.float32) + b1b_ref[...]

    # GEGLU: a * gelu(g)  (exact-erf GELU, matching PyTorch F.gelu default).
    act = a * _gelu_exact(g)

    # Dropout(p=0.0) is an identity in the forward pass.

    # Second Linear: cast activation to the weight dtype (bf16 path if weights
    # are bf16), accumulate in f32, add bias once.
    out = jnp.dot(act.astype(w2_ref.dtype), w2_ref[...],
                  preferred_element_type=jnp.float32) + b2_ref[...]

    o_ref[...] = out.astype(o_ref.dtype)


_VMEM_LIMIT_BYTES = 64 << 20  # fits v5e/v6e (128 MiB) and v7x (64 MiB) physical


def _pick_tile_m(M, C, H, itemsize, tile_m):
    """Clamp the row tile: 8-aligned, <= requested, and VMEM-safe."""
    tm = min(tile_m, max(8, ((M + 7) // 8) * 8))
    tm = max(8, (tm // 8) * 8)

    # Resident weights/biases (worst case assume double-buffered by Pallas).
    weight_bytes = 2 * ((3 * C * H) * itemsize + (2 * H + C) * 4)
    budget = int(_VMEM_LIMIT_BYTES * 0.75) - weight_bytes
    while tm > 8:
        # x tile + out tile (double-buffered) + f32 intermediates (a, g, act, out).
        tile_bytes = 2 * (2 * tm * C) * itemsize + tm * (3 * H + C) * 4
        if tile_bytes <= budget:
            break
        tm = max(8, (tm // 2 // 8) * 8)
    return tm


def feed_forward(x, w1, b1, w2, b2, *, tile_m=256):
    """x: (..., C). w1: (C, 2H), b1: (2H,), w2: (H, C), b2: (C,)."""
    orig_shape = x.shape
    C = orig_shape[-1]
    H = w2.shape[0]
    x2 = x.reshape(-1, C)
    M = x2.shape[0]

    tm = _pick_tile_m(M, C, H, jnp.dtype(x.dtype).itemsize, tile_m)
    pad = (-M) % tm
    if pad:
        x2 = jnp.pad(x2, ((0, pad), (0, 0)))
    Mp = x2.shape[0]

    # Pre-split first Linear into GEGLU value/gate halves; biases in f32 so the
    # kernel adds them directly onto the f32 MXU accumulators.
    w1a = w1[:, :H]
    w1b = w1[:, H:]
    b1a = b1[:H].reshape(1, H).astype(jnp.float32)
    b1b = b1[H:].reshape(1, H).astype(jnp.float32)
    b2_2d = b2.reshape(1, C).astype(jnp.float32)

    out = pl.pallas_call(
        ffn_kernel,
        out_shape=jax.ShapeDtypeStruct((Mp, C), x.dtype),
        grid=(Mp // tm,),
        in_specs=[
            pl.BlockSpec((tm, C), lambda i: (i, 0)),
            pl.BlockSpec((C, H), lambda i: (0, 0)),
            pl.BlockSpec((C, H), lambda i: (0, 0)),
            pl.BlockSpec((1, H), lambda i: (0, 0)),
            pl.BlockSpec((1, H), lambda i: (0, 0)),
            pl.BlockSpec((H, C), lambda i: (0, 0)),
            pl.BlockSpec((1, C), lambda i: (0, 0)),
        ],
        out_specs=pl.BlockSpec((tm, C), lambda i: (i, 0)),
        compiler_params=pltpu.CompilerParams(
            dimension_semantics=("parallel",),   # shards M across TCs on v7x
            vmem_limit_bytes=_VMEM_LIMIT_BYTES,
        ),
    )(x2, w1a, w1b, b1a, b1b, w2, b2_2d)

    if pad:
        out = out[:M]
    return out.reshape(orig_shape[:-1] + (C,))


def _reference(x, w1, b1, w2, b2):
    h = x @ w1 + b1
    H = w2.shape[0]
    a, g = h[..., :H], h[..., H:]
    act = a * (0.5 * g * (1.0 + jax.lax.erf(g / jnp.sqrt(2.0))))
    return act @ w2 + b2


if __name__ == "__main__":
    # Small shapes consistent with the module: channel=32, mult=4 -> hidden=128.
    batch, seq, channel, mult = 2, 8, 32, 4
    hidden = channel * mult

    key = jax.random.PRNGKey(0)
    kx, kw1, kb1, kw2, kb2 = jax.random.split(key, 5)

    x = jax.random.normal(kx, (batch, seq, channel), dtype=jnp.float32)

    # Deterministic parameter init (PyTorch Linear-like uniform bounds), stored as (in, out).
    bound1 = 1.0 / (channel ** 0.5)
    w1 = jax.random.uniform(kw1, (channel, hidden * 2), jnp.float32, -bound1, bound1)
    b1 = jax.random.uniform(kb1, (hidden * 2,), jnp.float32, -bound1, bound1)
    bound2 = 1.0 / (hidden ** 0.5)
    w2 = jax.random.uniform(kw2, (hidden, channel), jnp.float32, -bound2, bound2)
    b2 = jax.random.uniform(kb2, (channel,), jnp.float32, -bound2, bound2)

    out = feed_forward(x, w1, b1, w2, b2)
    out = jax.block_until_ready(out)

    ref = _reference(x, w1, b1, w2, b2)
    assert out.shape == (batch, seq, channel)
    assert jnp.allclose(out, ref, atol=1e-4, rtol=1e-4)

    print("KERNEL_OK")
</pallas_src>

<mosaic_0001>
module attributes {stable_mosaic.version = 11 : i64} {
  func.func @ffn_kernel(%arg0: i32, %arg1: memref<16x32xf32, #tpu.memory_space<vmem>>, %arg2: memref<32x128xf32, #tpu.memory_space<vmem>>, %arg3: memref<32x128xf32, #tpu.memory_space<vmem>>, %arg4: memref<1x128xf32, #tpu.memory_space<vmem>>, %arg5: memref<1x128xf32, #tpu.memory_space<vmem>>, %arg6: memref<128x32xf32, #tpu.memory_space<vmem>>, %arg7: memref<1x32xf32, #tpu.memory_space<vmem>>, %arg8: memref<16x32xf32, #tpu.memory_space<vmem>>) attributes {dimension_semantics = [#tpu.dimension_semantics<parallel>], iteration_bounds = array<i64: 1>, scalar_prefetch = 0 : i64, scratch_operands = 0 : i64, tpu.core_type = #tpu.core_type<tc>, window_params = [{transform_indices = @transform_0, window_bounds = array<i64: 16, 32>}, {pipeline_mode = #tpu.pipeline_mode<synchronous>, transform_indices = @transform_1, window_bounds = array<i64: 32, 128>}, {pipeline_mode = #tpu.pipeline_mode<synchronous>, transform_indices = @transform_2, window_bounds = array<i64: 32, 128>}, {pipeline_mode = #tpu.pipeline_mode<synchronous>, transform_indices = @transform_3, window_bounds = array<i64: 1, 128>}, {pipeline_mode = #tpu.pipeline_mode<synchronous>, transform_indices = @transform_4, window_bounds = array<i64: 1, 128>}, {pipeline_mode = #tpu.pipeline_mode<synchronous>, transform_indices = @transform_5, window_bounds = array<i64: 128, 32>}, {pipeline_mode = #tpu.pipeline_mode<synchronous>, transform_indices = @transform_6, window_bounds = array<i64: 1, 32>}, {transform_indices = @transform_7, window_bounds = array<i64: 16, 32>}]} {
    %c0 = arith.constant 0 : index
    %c0_0 = arith.constant 0 : index
    %0 = vector.load %arg1[%c0, %c0_0] : memref<16x32xf32, #tpu.memory_space<vmem>>, vector<16x32xf32>
    %c0_1 = arith.constant 0 : index
    %c0_2 = arith.constant 0 : index
    %1 = vector.load %arg2[%c0_1, %c0_2] : memref<32x128xf32, #tpu.memory_space<vmem>>, vector<32x128xf32>
    %cst = arith.constant dense<0.000000e+00> : vector<16x128xf32>
    %2 = tpu.matmul %0, %1, %cst {dimension_numbers = #tpu.dot_dimension_numbers<[1], [0], [0], [1], [0, 0, 1, 1], [], []>} : vector<16x32xf32>, vector<32x128xf32>, vector<16x128xf32> -> vector<16x128xf32>
    %c0_3 = arith.constant 0 : index
    %c0_4 = arith.constant 0 : index
    %3 = vector.load %arg4[%c0_3, %c0_4] : memref<1x128xf32, #tpu.memory_space<vmem>>, vector<1x128xf32>
    %4 = vector.broadcast %3 : vector<1x128xf32> to vector<16x128xf32>
    %5 = arith.addf %2, %4 : vector<16x128xf32>
    %c0_5 = arith.constant 0 : index
    %c0_6 = arith.constant 0 : index
    %6 = vector.load %arg3[%c0_5, %c0_6] : memref<32x128xf32, #tpu.memory_space<vmem>>, vector<32x128xf32>
    %cst_7 = arith.constant dense<0.000000e+00> : vector<16x128xf32>
    %7 = tpu.matmul %0, %6, %cst_7 {dimension_numbers = #tpu.dot_dimension_numbers<[1], [0], [0], [1], [0, 0, 1, 1], [], []>} : vector<16x32xf32>, vector<32x128xf32>, vector<16x128xf32> -> vector<16x128xf32>
    %c0_8 = arith.constant 0 : index
    %c0_9 = arith.constant 0 : index
    %8 = vector.load %arg5[%c0_8, %c0_9] : memref<1x128xf32, #tpu.memory_space<vmem>>, vector<1x128xf32>
    %9 = vector.broadcast %8 : vector<1x128xf32> to vector<16x128xf32>
    %10 = arith.addf %7, %9 : vector<16x128xf32>
    %cst_10 = arith.constant 5.000000e-01 : f32
    %11 = vector.broadcast %cst_10 : f32 to vector<16x128xf32>
    %12 = arith.mulf %11, %10 : vector<16x128xf32>
    %cst_11 = arith.constant 0.707106769 : f32
    %13 = vector.broadcast %cst_11 : f32 to vector<16x128xf32>
    %14 = arith.mulf %10, %13 : vector<16x128xf32>
    %15 = math.erf %14 : vector<16x128xf32>
    %cst_12 = arith.constant 1.000000e+00 : f32
    %16 = vector.broadcast %cst_12 : f32 to vector<16x128xf32>
    %17 = arith.addf %16, %15 : vector<16x128xf32>
    %18 = arith.mulf %12, %17 : vector<16x128xf32>
    %19 = arith.mulf %5, %18 : vector<16x128xf32>
    %c0_13 = arith.constant 0 : index
    %c0_14 = arith.constant 0 : index
    %20 = vector.load %arg6[%c0_13, %c0_14] : memref<128x32xf32, #tpu.memory_space<vmem>>, vector<128x32xf32>
    %cst_15 = arith.constant dense<0.000000e+00> : vector<16x32xf32>
    %21 = tpu.matmul %19, %20, %cst_15 {dimension_numbers = #tpu.dot_dimension_numbers<[1], [0], [0], [1], [0, 0, 1, 1], [], []>} : vector<16x128xf32>, vector<128x32xf32>, vector<16x32xf32> -> vector<16x32xf32>
    %c0_16 = arith.constant 0 : index
    %c0_17 = arith.constant 0 : index
    %22 = vector.load %arg7[%c0_16, %c0_17] : memref<1x32xf32, #tpu.memory_space<vmem>>, vector<1x32xf32>
    %23 = vector.broadcast %22 : vector<1x32xf32> to vector<16x32xf32>
    %24 = arith.addf %21, %23 : vector<16x32xf32>
    %c0_18 = arith.constant 0 : index
    %c0_19 = arith.constant 0 : index
    %25 = vector.load %arg8[%c0_18, %c0_19] : memref<16x32xf32, #tpu.memory_space<vmem>>, vector<16x32xf32>
    tpu.vector_store %arg8[%c0_18, %c0_19], %24 {strides = array<i32>} : memref<16x32xf32, #tpu.memory_space<vmem>>, vector<16x32xf32>,
    return
  }
  func.func @transform_0(%arg0: i32) -> (i32, i32) {
    %c0_i32 = arith.constant 0 : i32
    %c0_i32_0 = arith.constant 0 : i32
    return %arg0, %c0_i32 : i32, i32
  }
  func.func @transform_1(%arg0: i32) -> (i32, i32) {
    %c0_i32 = arith.constant 0 : i32
    %c0_i32_0 = arith.constant 0 : i32
    %c0_i32_1 = arith.constant 0 : i32
    return %c0_i32, %c0_i32_0 : i32, i32
  }
  func.func @transform_2(%arg0: i32) -> (i32, i32) {
    %c0_i32 = arith.constant 0 : i32
    %c0_i32_0 = arith.constant 0 : i32
    %c0_i32_1 = arith.constant 0 : i32
    return %c0_i32, %c0_i32_0 : i32, i32
  }
  func.func @transform_3(%arg0: i32) -> (i32, i32) {
    %c0_i32 = arith.constant 0 : i32
    %c0_i32_0 = arith.constant 0 : i32
    %c0_i32_1 = arith.constant 0 : i32
    return %c0_i32, %c0_i32_0 : i32, i32
  }
  func.func @transform_4(%arg0: i32) -> (i32, i32) {
    %c0_i32 = arith.constant 0 : i32
    %c0_i32_0 = arith.constant 0 : i32
    %c0_i32_1 = arith.constant 0 : i32
    return %c0_i32, %c0_i32_0 : i32, i32
  }
  func.func @transform_5(%arg0: i32) -> (i32, i32) {
    %c0_i32 = arith.constant 0 : i32
    %c0_i32_0 = arith.constant 0 : i32
    %c0_i32_1 = arith.constant 0 : i32
    return %c0_i32, %c0_i32_0 : i32, i32
  }
  func.func @transform_6(%arg0: i32) -> (i32, i32) {
    %c0_i32 = arith.constant 0 : i32
    %c0_i32_0 = arith.constant 0 : i32
    %c0_i32_1 = arith.constant 0 : i32
    return %c0_i32, %c0_i32_0 : i32, i32
  }
  func.func @transform_7(%arg0: i32) -> (i32, i32) {
    %c0_i32 = arith.constant 0 : i32
    %c0_i32_0 = arith.constant 0 : i32
    return %arg0, %c0_i32 : i32, i32
  }
}

</mosaic_0001>

<bundles_post_ra>
// kernel: tpu_custom_call.1
= control target key start
LH: loop header
LB: loop body
LE: loop exit
PB: predicated region body
PF: predicated region fallthrough
CT: control target
= control target key end

     0   :  { %s478_s0 = inlined_call_operand.vmem [shape: f32[16,32], index: 0, kind: input, shape index: {}]   ;;  %s479_s1 = inlined_call_operand.vmem [shape: f32[32,128], index: 1, kind: input, shape index: {}]   ;;  %s480_s2 = inlined_call_operand.vmem [shape: f32[32,128], index: 2, kind: input, shape index: {}]   ;;  %s481_s3 = inlined_call_operand.vmem [shape: f32[1,128], index: 3, kind: input, shape index: {}]   ;;  %s482_s4 = inlined_call_operand.vmem [shape: f32[1,128], index: 4, kind: input, shape index: {}]   ;;  %s483_s5 = inlined_call_operand.vmem [shape: f32[128,32], index: 5, kind: input, shape index: {}]   ;;  %s484_s6 = inlined_call_operand.vmem [shape: f32[1,32], index: 6, kind: input, shape index: {}]   ;;  %s485_s7 = inlined_call_operand.hbm [shape: f32[16,32], index: 7, kind: output, shape index: {}]  }
   0x1   :  { %v70_v0 = vld [vmem:[%s480_s2 + $0x18] sm:$0xff]  ;;  %v69_v1 = vld [vmem:[%s480_s2 + $0x10] sm:$0xff]  ;;  %v68_v2 = vld [vmem:[%s480_s2 + $0x8] sm:$0xff] }
   0x2   :  { %87 = vmatpush.msra.mxu1 %v70_v0  ;;  %v32_v3 = vld [vmem:[%s479_s1 + $0x18] sm:$0xff]  ;;  %v31_v4 = vld [vmem:[%s479_s1 + $0x10] sm:$0xff]  ;;  %v67_v5 = vld [vmem:[%s480_s2] sm:$0xff] }
   0x3   :  { %56 = vmatpush.msra.mxu0 %v32_v3  ;;  %v30_v6 = vld [vmem:[%s479_s1 + $0x8] sm:$0xff] }
   0x4   :  { %88 = vmatpush.msra.mxu1 %v69_v1 }
   0x5   :  { %12 = vsyncpa [#allocation3], 0  ;;  %v27_v7 = vld [vmem:[%s478_s0] sm:$0xff]  ;;  %vm37_vm0 = vcmask 261120   ;;  %57 = vmatpush.msra.mxu0 %v31_v4  ;;  %v28_v9 = vld [vmem:[%s478_s0 + $0x8] sm:$0xff]  ;;  %s309_s27 = smov [#allocation2]  }
   0x6   :  { %89 = vmatpush.msra.mxu1 %v68_v2  ;;  %v29_v8 = vld [vmem:[%s479_s1] sm:$0xff]  ;;  %v203_v10 = vld [vmem:[%s483_s5 + $0x78] sm:$0xff]  ;;  %v202_v11 = vld [vmem:[%s483_s5 + $0x70] sm:$0xff]  ;;  %s237_s28 = sshll.u32 %s309_s27, 4  ;;  %s239_s8 = sshll.u32 %s485_s7, 4  ;;  %s238_s28 = int_to_ptr.vmem [resolvable:$true] %s237_s28  ;;  %s240_s8 = int_to_ptr.hbm [resolvable:$true] %s239_s8 }
   0x7   :  { %58 = vmatpush.msra.mxu0 %v30_v6  ;;  %208 = vmatpush.msra.mxu2 %v203_v10  ;;  %v201_v12 = vld [vmem:[%s483_s5 + $0x68] sm:$0xff]  ;;  %v276_v13 = vld [vmem:[%s482_s4] ss:$0 sm:$0xff]  ;;  %v199_v16 = vld [vmem:[%s483_s5 + $0x58] sm:$0xff]  ;;  %s310_s4 = smov 128   ;;  %s311_s9 = smov 8  }
   0x8   :  { %90 = vmatpush.msra.mxu1 %v67_v5  ;;  %257 = vmatpush.msra.mxu3 %v203_v10  ;;  %v200_v14 = vld [vmem:[%s483_s5 + $0x60] sm:$0xff]  ;;  %v198_v18 = vld [vmem:[%s483_s5 + $0x50] sm:$0xff]  ;;  %v197_v20 = vld [vmem:[%s483_s5 + $0x48] sm:$0xff] }
   0x9   :  { %253 = vmatmul.msk.f32.vlgmr.msra.gmra.mxu1 %vm37_vm0, %v27_v7  ;;  %59 = vmatpush.msra.mxu0 %v29_v8  ;;  %v196_v22 = vld [vmem:[%s483_s5 + $0x40] sm:$0xff]  ;;  %v195_v23 = vld [vmem:[%s483_s5 + $0x38] sm:$0xff]  ;;  %v194_v26 = vld [vmem:[%s483_s5 + $0x30] sm:$0xff] }
   0xa   :  { %251 = vmatmul.msk.f32.vlgmr.msra.gmra.mxu0 %vm37_vm0, %v27_v7  ;;  %209 = vmatpush.msra.mxu2 %v202_v11  ;;  %v193_v30 = vld [vmem:[%s483_s5 + $0x28] sm:$0xff]  ;;  %v192_v33 = vld [vmem:[%s483_s5 + $0x20] sm:$0xff]  ;;  %v191_v37 = vld [vmem:[%s483_s5 + $0x18] sm:$0xff] }
   0xb   :  { %258 = vmatpush.msra.mxu3 %v202_v11  ;;  %v190_v40 = vld [vmem:[%s483_s5 + $0x10] sm:$0xff]  ;;  %v189_v45 = vld [vmem:[%s483_s5 + $0x8] sm:$0xff]  ;;  %v188_v49 = vld [vmem:[%s483_s5] sm:$0xff] }
   0xc   :  { %210 = vmatpush.msra.mxu2 %v201_v12 }
   0xd   :  { %259 = vmatpush.msra.mxu3 %v201_v12 }
   0xe   :  { %211 = vmatpush.msra.mxu2 %v200_v14 }
   0xf   :  { %260 = vmatpush.msra.mxu3 %v200_v14 }
  0x10   :  { %212 = vmatpush.msra.mxu2 %v199_v16 }
  0x11   :  { %254 = vmatmul.msk.f32.gmra.mxu1 %vm37_vm0, %v28_v9  ;;  %261 = vmatpush.msra.mxu3 %v199_v16 }
  0x12   :  { %252 = vmatmul.msk.f32.gmra.mxu0 %vm37_vm0, %v28_v9  ;;  %213 = vmatpush.msra.mxu2 %v198_v18 }
  0x13   :  { %262 = vmatpush.msra.mxu3 %v198_v18 }
  0x14   :  { %214 = vmatpush.msra.mxu2 %v197_v20 }
  0x15   :  { %263 = vmatpush.msra.mxu3 %v197_v20 }
  0x16   :  { %215 = vmatpush.msra.mxu2 %v196_v22 }
  0x17   :  { %264 = vmatpush.msra.mxu3 %v196_v22 }
  0x18   :  { %216 = vmatpush.msra.mxu2 %v195_v23 }
  0x19   :  { %265 = vmatpush.msra.mxu3 %v195_v23 }
  0x1a   :  { %217 = vmatpush.msra.mxu2 %v194_v26 }
  0x1b   :  { %266 = vmatpush.msra.mxu3 %v194_v26 }
  0x1c   :  { %218 = vmatpush.msra.mxu2 %v193_v30 }
  0x1d   :  { %267 = vmatpush.msra.mxu3 %v193_v30  ;;  %v277_v30 = vld [vmem:[%s481_s3] ss:$0 sm:$0xff] }
  0x1e   :  { %219 = vmatpush.msra.mxu2 %v192_v33 }
  0x1f   :  { %268 = vmatpush.msra.mxu3 %v192_v33 }
  0x20   :  { %220 = vmatpush.msra.mxu2 %v191_v37 }
  0x21   :  { %269 = vmatpush.msra.mxu3 %v191_v37 }
  0x22   :  { %221 = vmatpush.msra.mxu2 %v190_v40 }
  0x23   :  { %270 = vmatpush.msra.mxu3 %v190_v40 }
  0x24   :  { %222 = vmatpush.msra.mxu2 %v189_v45 }
  0x25   :  { %271 = vmatpush.msra.mxu3 %v189_v45 }
  0x26   :  { %223 = vmatpush.msra.mxu2 %v188_v49 }
  0x27   :  { %272 = vmatpush.msra.mxu3 %v188_v49 }
  0x86   :  { %v92_v15 = vpop.f32.mrf.mxu1 }
  0x87   :  { %v404_v17 = vadd.f32 %v276_v13, %v92_v15  ;;  %v61_v26 = vpop.f32.mrf.mxu0 }
  0x89   :  { %v410_v19 = vmul.f32 0.70710677, %v404_v17 }
  0x8b   :  { %v102_v21 = vmul.f32 %v410_v19, %v410_v19 }
  0x8d   :  { %v423_v24 = vmin.f32 %v102_v21, 16.0 }
  0x8e   :  { %v95_v25 = vpop.f32.mrf.mxu1 }
  0x8f   :  { %v104_v27 = vmul.f32 2.1237322e-06, %v423_v24  ;;  %v429_v28 = vadd.f32 %v276_v13, %v95_v25  ;;  %v115_v29 = vmul.f32 3.8918573e-05, %v423_v24 }
  0x91   :  { %v105_v31 = vadd.f32 0.00028619796, %v104_v27  ;;  %v436_v32 = vmul.f32 0.70710677, %v429_v28  ;;  %v116_v34 = vadd.f32 0.001143296, %v115_v29 }
  0x93   :  { %v106_v35 = vmul.f32 %v105_v31, %v423_v24  ;;  %v142_v36 = vmul.f32 %v436_v32, %v436_v32  ;;  %v117_v38 = vmul.f32 %v116_v34, %v423_v24 }
  0x95   :  { %v143_v39 = vmin.f32 %v142_v36, 16.0  ;;  %v118_v41 = vadd.f32 0.014752088, %v117_v38  ;;  %v107_v42 = vadd.f32 0.0036580483, %v106_v35 }
  0x97   :  { %v144_v43 = vmul.f32 2.1237322e-06, %v143_v39  ;;  %v155_v44 = vmul.f32 3.8918573e-05, %v143_v39  ;;  %v119_v46 = vmul.f32 %v118_v41, %v423_v24  ;;  %v108_v51 = vmul.f32 %v107_v42, %v423_v24 }
  0x99   :  { %v145_v47 = vadd.f32 0.00028619796, %v144_v43  ;;  %v156_v48 = vadd.f32 0.001143296, %v155_v44  ;;  %v120_v50 = vadd.f32 0.112945676, %v119_v46 }
  0x9a   :  { %v109_v58 = vadd.f32 0.05243302, %v108_v51 }
  0x9b   :  { %v146_v52 = vmul.f32 %v145_v47, %v143_v39  ;;  %v157_v53 = vmul.f32 %v156_v48, %v143_v39  ;;  %v121_v54 = vmul.f32 %v120_v50, %v423_v24  ;;  %v64_v48 = vpop.f32.mrf.mxu0  ;;  %v99_v50 = vmul.f32 0.5, %v429_v28 }
  0x9c   :  { %v110_v0 = vmul.f32 %v109_v58, %v423_v24  ;;  %v65_v51 = vadd.f32 %v277_v30, %v64_v48 }
  0x9d   :  { %v158_v55 = vadd.f32 0.014752088, %v157_v53  ;;  %v147_v56 = vadd.f32 0.0036580483, %v146_v52  ;;  %v122_v57 = vadd.f32 0.4994258, %v121_v54 }
  0x9e   :  { %v111_v4 = vadd.f32 0.18741608, %v110_v0 }
  0x9f   :  { %v159_v59 = vmul.f32 %v158_v55, %v143_v39  ;;  %v123_v60 = vmul.f32 %v122_v57, %v423_v24  ;;  %v148_v62 = vmul.f32 %v147_v56, %v143_v39 }
  0xa0   :  { %v112_v9 = vmul.f32 %v111_v4, %v423_v24 }
  0xa1   :  { %v160_v61 = vadd.f32 0.112945676, %v159_v59  ;;  %v124_v63 = vadd.f32 1.0, %v123_v60  ;;  %v149_v3 = vadd.f32 0.05243302, %v148_v62 }
  0xa2   :  { %v113_v14 = vadd.f32 1.1283791, %v112_v9 }
  0xa3   :  { %v161_v1 = vmul.f32 %v160_v61, %v143_v39  ;;  %279 = vrcp.f32 %v124_v63  ;;  %v150_v8 = vmul.f32 %v149_v3, %v143_v39  ;;  %v136_v13 = vand.u32 2147483648, %v124_v63 }
  0xa4   :  { %v134_v16 = vand.u32 2147483647, %v124_v63  ;;  %vm130_vm2 = vweird.f32 %v124_v63  ;;  %v114_v25 = vmul.f32 %v113_v14, %v410_v19  ;;  %v98_v19 = vmul.f32 0.5, %v404_v17 }
  0xa5   :  { %v162_v2 = vadd.f32 0.4994258, %v161_v1  ;;  %v151_v12 = vadd.f32 0.18741608, %v150_v8  ;;  %v137_v22 = vor.u32 1.1754944e-38, %v136_v13 }
  0xa6   :  { %vm135_vm4 = vcmp.eq.f32.partialorder %v134_v16, 8.507059e+37 }
  0xa7   :  { %v163_v5 = vmul.f32 %v162_v2, %v143_v39  ;;  %v152_v21 = vmul.f32 %v151_v12, %v143_v39  ;;  %v62_v39 = vadd.f32 %v277_v30, %v61_v26 }
  0xa9   :  { %v164_v6 = vadd.f32 1.0, %v163_v5  ;;  %v280_v7 = vpop.eup %279  ;;  %v153_v34 = vadd.f32 1.1283791, %v152_v21 }
  0xaa   :  { %v126_v10 = vmul.f32 %v280_v7, %v124_v63  ;;  %vm131_vm1 = vweird.f32 %v280_v7 }
  0xab   :  { %281 = vrcp.f32 %v164_v6  ;;  %vm132_vm3 = vmor %vm130_vm2, %vm131_vm1  ;;  %v176_v33 = vand.u32 2147483648, %v164_v6  ;;  %v174_v36 = vand.u32 2147483647, %v164_v6  ;;  %vm170_vm6 = vweird.f32 %v164_v6 }
  0xac   :  { %v127_v11 = vsub.f32 1.0, %v126_v10  ;;  %v154_v42 = vmul.f32 %v153_v34, %v436_v32  ;;  %v278_v32 = vld [vmem:[%s484_s6] ss:$0 sm:$0xff] }
  0xad   :  { %v177_v41 = vor.u32 1.1754944e-38, %v176_v33  ;;  %vm175_vm8 = vcmp.eq.f32.partialorder %v174_v36, 8.507059e+37 }
  0xae   :  { %v128_v15 = vmul.f32 %v280_v7, %v127_v11 }
  0xb0   :  { %v129_v20 = vadd.f32 %v280_v7, %v128_v15 }
  0xb1   :  { %v282_v18 = vpop.eup %281 }
  0xb2   :  { %v166_v23 = vmul.f32 %v282_v18, %v164_v6  ;;  %v133_v24 = vsel %vm132_vm3, %v280_v7, %v129_v20  ;;  %vm171_vm5 = vweird.f32 %v282_v18 }
  0xb3   :  { %v138_v27 = vsel %vm135_vm4, %v137_v22, %v133_v24  ;;  %vm172_vm7 = vmor %vm170_vm6, %vm171_vm5 }
  0xb4   :  { %v167_v29 = vsub.f32 1.0, %v166_v23  ;;  %v139_v31 = vmul.f32 %v138_v27, %v114_v25 }
  0xb6   :  { %v168_v35 = vmul.f32 %v282_v18, %v167_v29  ;;  %v255_v37 = vclamps-f32 %v139_v31, 1.0 }
  0xb8   :  { %v169_v38 = vadd.f32 %v282_v18, %v168_v35  ;;  %v182_v40 = vadd.f32 1.0, %v255_v37 }
  0xba   :  { %v173_v43 = vsel %vm172_vm7, %v282_v18, %v169_v38  ;;  %v184_v44 = vmul.f32 %v182_v40, %v98_v19 }
  0xbb   :  { %v178_v45 = vsel %vm175_vm8, %v177_v41, %v173_v43 }
  0xbc   :  { %v179_v46 = vmul.f32 %v178_v45, %v154_v42  ;;  %v186_v47 = vmul.f32 %v184_v44, %v62_v39 }
  0xbe   :  { %v256_v49 = vclamps-f32 %v179_v46, 1.0  ;;  %224 = vmatmul.f32.vlgmr.msra.gmra.mxu2 %v186_v47 }
  0xc0   :  { %v183_v52 = vadd.f32 1.0, %v256_v49 }
  0xc2   :  { %v185_v17 = vmul.f32 %v183_v52, %v99_v50 }
  0xc4   :  { %v187_v53 = vmul.f32 %v185_v17, %v65_v51 }
  0xc6   :  { %227 = vmatmul.f32.vlgmr.msra.gmra.mxu3 %v187_v53 }
 0x141   :  { %v225_v54 = vpop.f32.mrf.mxu2 }
 0x142   :  { %v226_v55 = vadd.f32 %v278_v32, %v225_v54 }
 0x144   :  { %231 = vst.msk [vmem:[#allocation2] sm:$0xff] %vm37_vm0, %v226_v55 }
 0x149   :  { %v228_v28 = vpop.f32.mrf.mxu3 }
 0x14a   :  { %v229_v56 = vadd.f32 %v278_v32, %v228_v28 }
 0x14c   :  { %232 = vst.msk [vmem:[#allocation2 + $0x8] sm:$0xff] %vm37_vm0, %v229_v56 }
 0x14d   :  { %245 = dma.vmem_to_hbm [thread:$0]  %s238_s28, 256, %s240_s8, [#allocation3], %s310_s4, %s310_s4, %s311_s9  }
 0x14e   :  { %307 = dma.done.wait [#allocation3], 256  }
 0x14f   :  { %308 = vsyncadd [#allocation3], 4294967040 }
 0x150   :  { %250 = vsyncpa [#allocation3], 1 }

</bundles_post_ra>
